<compile_context>
chip_gen: v6e
topology: v6e:2x2x1
jax: 0.10.0
libtpu: 0.0.40
codegen_flags: <defaults>
</compile_context>

<pallas_src>
import jax
import jax.numpy as jnp
from jax import lax
from jax.experimental import pallas as pl
from jax.experimental.pallas import tpu as pltpu


def _adaptive_pooling_kernel(x_ref, m_ref, w_ref, b_ref, bw_ref, bb_ref, out_ref):
    # x_ref : (TB, L, D)   token embeddings for TB batch elements
    # m_ref : (TB, L, 1)   attention mask (float, 0 = padding)
    # w_ref : (D, D)       linear weight laid out [D_in, D_out]
    # b_ref : (1, D)       linear bias
    # bw_ref: (1, D)       balance weight
    # bb_ref: (1, 1)       balance bias
    # out_ref: (TB, D)     pooled features
    TB, L, D = x_ref.shape

    x = x_ref[...]                                   # [TB, L, D]
    m = m_ref[...]                                   # [TB, L, 1]
    pad = m == 0.0                                   # [TB, L, 1] bool

    # masked_fill(mask == 0, -1000)
    xf = jnp.where(pad, jnp.float32(-1000.0), x)     # [TB, L, D]

    # ---------- embed pooling: softmax over the per-column descending sort ----------
    # max / sum of exp are permutation invariant -> compute on the unsorted values.
    mx = jnp.max(xf, axis=1, keepdims=True)          # [TB, 1, D]
    ex = jnp.exp(xf - mx)                            # [TB, L, D]
    inv_z = pl.reciprocal(jnp.sum(ex, axis=1, keepdims=True), approx=True)  # [TB, 1, D]

    # Descending rank with stable tie-break (earlier index ranks first), as f32 counts.
    # cnt[b,i,d] = #{ j : xf[b,j,d] > xf[b,i,d]  or  (xf[b,j,d] == xf[b,i,d] and j < i) }
    pos = lax.broadcasted_iota(jnp.int32, (1, L, 1), 1).astype(jnp.float32)  # 0..L-1
    cnt = jnp.zeros((TB, L, D), jnp.float32)
    for j in range(L):                               # L is small & static: unrolled VPU passes
        xj = xf[:, j:j + 1, :]                       # [TB, 1, D]
        beats = jnp.logical_or(xj > xf,
                               jnp.logical_and(xj == xf, pos > float(j)))
        cnt = cnt + jnp.where(beats, 1.0, 0.0)

    # Scatter exp numerators to their sorted position: num[:, r, :] = exp(sorted[:, r, :] - mx)
    num = jnp.zeros((TB, L, D), jnp.float32)
    for j in range(L):
        cj = cnt[:, j:j + 1, :]                      # rank of source element j
        ej = ex[:, j:j + 1, :]
        num = num + jnp.where(pos == cj, ej, 0.0)

    ew = num * inv_z                                 # softmax(sorted, dim=L)
    embed_features = jnp.sum(xf * ew, axis=1)        # [TB, D]

    # ---------- token pooling: softmax(relu(linear(x.masked_fill(mask==0, 0)))) ----------
    xz = jnp.where(pad, 0.0, x)                      # [TB, L, D]
    h = jnp.dot(xz.reshape(TB * L, D), w_ref[...],
                preferred_element_type=jnp.float32) + b_ref[...]   # [TB*L, D]
    h = jnp.maximum(h, 0.0).reshape(TB, L, D)
    hm = jnp.max(h, axis=1, keepdims=True)
    he = jnp.exp(h - hm)
    tws = he * pl.reciprocal(jnp.sum(he, axis=1, keepdims=True), approx=True)
    token_features = jnp.sum(xz * tws, axis=1)       # [TB, D]

    # ---------- balance fusion (softmax over the 2 pooled vectors) ----------
    bw = bw_ref[...]                                 # [1, D]
    bb = bb_ref[...]                                 # [1, 1]
    lt = jnp.sum(token_features * bw, axis=1, keepdims=True) + bb   # [TB, 1]
    le = jnp.sum(embed_features * bw, axis=1, keepdims=True) + bb   # [TB, 1]
    mm = jnp.maximum(lt, le)
    et = jnp.exp(lt - mm)
    ee = jnp.exp(le - mm)
    inv = pl.reciprocal(et + ee, approx=True)
    out_ref[...] = token_features * (et * inv) + embed_features * (ee * inv)   # [TB, D]


def adaptive_pooling(token_embeddings, attention_mask, w_in_out, bias, bal_w, bal_b,
                     *, block_b=None):
    """token_embeddings: [B, L, D], attention_mask: [B, L] (0/1). Returns ([B, D], None)."""
    B, L, D = token_embeddings.shape
    x = token_embeddings.astype(jnp.float32)
    m = attention_mask.astype(jnp.float32).reshape(B, L, 1)

    # Batch block: target a fused (block_b*L, D) matmul with M ~ 256 rows (MXU-friendly
    # on v6e/v7x, >=128 on v5e) while keeping the block a multiple of 8 sublanes when
    # the batch has to be split.
    if block_b is None:
        target = max(1, 256 // L)
        if B <= target:
            block_b = B                       # single block == full batch dim
        else:
            block_b = max(8, (target // 8) * 8)
    nb = pl.cdiv(B, block_b)
    Bp = nb * block_b
    if Bp != B:
        # Pad with zero embeddings / mask==1 rows (harmless, sliced off below).
        x = jnp.concatenate([x, jnp.zeros((Bp - B, L, D), jnp.float32)], axis=0)
        m = jnp.concatenate([m, jnp.ones((Bp - B, L, 1), jnp.float32)], axis=0)

    w = w_in_out.astype(jnp.float32)
    b2 = bias.reshape(1, D).astype(jnp.float32)
    bw2 = bal_w.reshape(1, D).astype(jnp.float32)
    bb2 = bal_b.reshape(1, 1).astype(jnp.float32)

    out = pl.pallas_call(
        _adaptive_pooling_kernel,
        out_shape=jax.ShapeDtypeStruct((Bp, D), jnp.float32),
        grid=(nb,),
        in_specs=[
            pl.BlockSpec((block_b, L, D), lambda i: (i, 0, 0)),
            pl.BlockSpec((block_b, L, 1), lambda i: (i, 0, 0)),
            pl.BlockSpec((D, D), lambda i: (0, 0)),
            pl.BlockSpec((1, D), lambda i: (0, 0)),
            pl.BlockSpec((1, D), lambda i: (0, 0)),
            pl.BlockSpec((1, 1), lambda i: (0, 0)),
        ],
        out_specs=pl.BlockSpec((block_b, D), lambda i: (i, 0)),
        compiler_params=pltpu.CompilerParams(
            dimension_semantics=("parallel",)),
    )(x, m, w, b2, bw2, bb2)
    return out[:B], None


def adaptive_pooling_reference(x, mask, w_in_out, bias, bal_w, bal_b):
    """Pure-JAX reference mirroring the PyTorch forward (default MXU precision)."""
    m = mask[:, :, None].astype(jnp.float32)
    xf = jnp.where(m == 0, -1000.0, x)
    xs = -jnp.sort(-xf, axis=1)                                   # descending sort values
    ew = jax.nn.softmax(xs, axis=1)
    embed_features = jnp.sum(xf * ew, axis=1)
    xz = jnp.where(m == 0, 0.0, x)
    tw = jnp.einsum("bld,de->ble", xz, w_in_out) + bias
    tw = jax.nn.softmax(jnp.maximum(tw, 0.0), axis=1)
    token_features = jnp.sum(xz * tw, axis=1)
    fusion = jnp.stack([token_features, embed_features], axis=1)  # [B, 2, D]
    logits = jnp.einsum("bkd,d->bk", fusion, bal_w.reshape(-1)) + bal_b.reshape(())
    fw = jax.nn.softmax(logits, axis=1)[:, :, None]
    return jnp.sum(fusion * fw, axis=1)


if __name__ == "__main__":
    B, L, D = 2, 8, 32
    key = jax.random.PRNGKey(0)
    kx, kw, kbw, kbb = jax.random.split(key, 4)

    # Deterministic parameter init (shapes from the module's __init__)
    r = (6.0 ** 0.5) / ((D + D) ** 0.5)
    w_torch = jax.random.uniform(kw, (D, D), jnp.float32, -r, r)   # [out, in] like nn.Linear
    w_in_out = w_torch.T                                           # used as x @ W
    bias = jnp.zeros((D,), jnp.float32)                            # linear.bias.fill_(0)
    r2 = 1.0 / (D ** 0.5)
    bal_w = jax.random.uniform(kbw, (1, D), jnp.float32, -r2, r2)  # balance weight [1, D]
    bal_b = jax.random.uniform(kbb, (1,), jnp.float32, -r2, r2)    # balance bias [1]

    x = jax.random.normal(kx, (B, L, D), jnp.float32)
    # attention mask with some padding in the second batch element
    mask = jnp.array([[1] * L, [1] * 5 + [0] * (L - 5)], dtype=jnp.float32)

    out, _ = adaptive_pooling(x, mask, w_in_out, bias, bal_w, bal_b)
    out = jax.block_until_ready(out)

    ref = adaptive_pooling_reference(x, mask, w_in_out, bias, bal_w, bal_b)
    assert out.shape == (B, D)
    # approx-reciprocal (EUP) + default MXU precision -> allow a few e-3 slack
    assert jnp.allclose(out, ref, rtol=5e-3, atol=5e-3), (out, ref)

    print("KERNEL_OK")
</pallas_src>

<mosaic_0001>
module attributes {stable_mosaic.version = 11 : i64} {
  func.func @_adaptive_pooling_kernel(%arg0: i32, %arg1: memref<2x8x32xf32, #tpu.memory_space<vmem>>, %arg2: memref<2x8x1xf32, #tpu.memory_space<vmem>>, %arg3: memref<32x32xf32, #tpu.memory_space<vmem>>, %arg4: memref<1x32xf32, #tpu.memory_space<vmem>>, %arg5: memref<1x32xf32, #tpu.memory_space<vmem>>, %arg6: memref<1x1xf32, #tpu.memory_space<vmem>>, %arg7: memref<2x32xf32, #tpu.memory_space<vmem>>) attributes {dimension_semantics = [#tpu.dimension_semantics<parallel>], iteration_bounds = array<i64: 1>, scalar_prefetch = 0 : i64, scratch_operands = 0 : i64, tpu.core_type = #tpu.core_type<tc>, window_params = [{transform_indices = @transform_0, window_bounds = array<i64: 2, 8, 32>}, {transform_indices = @transform_1, window_bounds = array<i64: 2, 8, 1>}, {pipeline_mode = #tpu.pipeline_mode<synchronous>, transform_indices = @transform_2, window_bounds = array<i64: 32, 32>}, {pipeline_mode = #tpu.pipeline_mode<synchronous>, transform_indices = @transform_3, window_bounds = array<i64: 1, 32>}, {pipeline_mode = #tpu.pipeline_mode<synchronous>, transform_indices = @transform_4, window_bounds = array<i64: 1, 32>}, {pipeline_mode = #tpu.pipeline_mode<synchronous>, transform_indices = @transform_5, window_bounds = array<i64: 1, 1>}, {transform_indices = @transform_6, window_bounds = array<i64: 2, 32>}]} {
    %c0 = arith.constant 0 : index
    %c0_0 = arith.constant 0 : index
    %c0_1 = arith.constant 0 : index
    %0 = vector.load %arg1[%c0, %c0_0, %c0_1] : memref<2x8x32xf32, #tpu.memory_space<vmem>>, vector<2x8x32xf32>
    %c0_2 = arith.constant 0 : index
    %c0_3 = arith.constant 0 : index
    %c0_4 = arith.constant 0 : index
    %1 = vector.load %arg2[%c0_2, %c0_3, %c0_4] : memref<2x8x1xf32, #tpu.memory_space<vmem>>, vector<2x8x1xf32>
    %cst = arith.constant 0.000000e+00 : f32
    %2 = vector.broadcast %cst : f32 to vector<2x8x1xf32>
    %3 = arith.cmpf oeq, %1, %2 : vector<2x8x1xf32>
    %cst_5 = arith.constant -1.000000e+03 : f32
    %4 = vector.shape_cast %3 : vector<2x8x1xi1> to vector<2x8x1xi1>
    %5 = vector.broadcast %4 : vector<2x8x1xi1> to vector<2x8x32xi1>
    %6 = vector.broadcast %cst_5 : f32 to vector<2x8x32xf32>
    %7 = arith.select %5, %6, %0 : vector<2x8x32xi1>, vector<2x8x32xf32>
    %cst_6 = arith.constant dense<0xFF800000> : vector<2x32xf32>
    %8 = vector.multi_reduction <maximumf>, %7, %cst_6 [1] : vector<2x8x32xf32> to vector<2x32xf32>
    %9 = vector.shape_cast %8 : vector<2x32xf32> to vector<2x1x32xf32>
    %10 = vector.broadcast %9 : vector<2x1x32xf32> to vector<2x8x32xf32>
    %11 = arith.subf %7, %10 : vector<2x8x32xf32>
    %12 = math.exp %11 : vector<2x8x32xf32>
    %cst_7 = arith.constant dense<0.000000e+00> : vector<2x32xf32>
    %13 = vector.multi_reduction <add>, %12, %cst_7 [1] : vector<2x8x32xf32> to vector<2x32xf32>
    %14 = vector.shape_cast %13 : vector<2x32xf32> to vector<2x1x32xf32>
    %15 = tpu.reciprocal %14 {approx = true} : vector<2x1x32xf32> -> vector<2x1x32xf32>
    %16 = tpu.iota {dimensions = array<i32: 1>} : vector<1x8x1xi32>
    %17 = arith.sitofp %16 : vector<1x8x1xi32> to vector<1x8x1xf32>
    %cst_8 = arith.constant 0.000000e+00 : f32
    %18 = vector.broadcast %cst_8 : f32 to vector<2x8x32xf32>
    %19 = vector.extract_strided_slice %7 {offsets = [0, 0, 0], sizes = [2, 1, 32], strides = [1, 1, 1]} : vector<2x8x32xf32> to vector<2x1x32xf32>
    %20 = vector.broadcast %19 : vector<2x1x32xf32> to vector<2x8x32xf32>
    %21 = arith.cmpf ogt, %20, %7 : vector<2x8x32xf32>
    %22 = vector.broadcast %19 : vector<2x1x32xf32> to vector<2x8x32xf32>
    %23 = arith.cmpf oeq, %22, %7 : vector<2x8x32xf32>
    %cst_9 = arith.constant 0.000000e+00 : f32
    %24 = vector.broadcast %cst_9 : f32 to vector<1x8x1xf32>
    %25 = arith.cmpf ogt, %17, %24 : vector<1x8x1xf32>
    %26 = vector.broadcast %25 : vector<1x8x1xi1> to vector<2x8x32xi1>
    %27 = arith.andi %23, %26 : vector<2x8x32xi1>
    %28 = arith.ori %21, %27 : vector<2x8x32xi1>
    %cst_10 = arith.constant 1.000000e+00 : f32
    %cst_11 = arith.constant 0.000000e+00 : f32
    %29 = vector.broadcast %cst_10 : f32 to vector<2x8x32xf32>
    %30 = vector.broadcast %cst_11 : f32 to vector<2x8x32xf32>
    %31 = arith.select %28, %29, %30 : vector<2x8x32xi1>, vector<2x8x32xf32>
    %32 = arith.addf %18, %31 : vector<2x8x32xf32>
    %33 = vector.extract_strided_slice %7 {offsets = [0, 1, 0], sizes = [2, 1, 32], strides = [1, 1, 1]} : vector<2x8x32xf32> to vector<2x1x32xf32>
    %34 = vector.broadcast %33 : vector<2x1x32xf32> to vector<2x8x32xf32>
    %35 = arith.cmpf ogt, %34, %7 : vector<2x8x32xf32>
    %36 = vector.broadcast %33 : vector<2x1x32xf32> to vector<2x8x32xf32>
    %37 = arith.cmpf oeq, %36, %7 : vector<2x8x32xf32>
    %cst_12 = arith.constant 1.000000e+00 : f32
    %38 = vector.broadcast %cst_12 : f32 to vector<1x8x1xf32>
    %39 = arith.cmpf ogt, %17, %38 : vector<1x8x1xf32>
    %40 = vector.broadcast %39 : vector<1x8x1xi1> to vector<2x8x32xi1>
    %41 = arith.andi %37, %40 : vector<2x8x32xi1>
    %42 = arith.ori %35, %41 : vector<2x8x32xi1>
    %cst_13 = arith.constant 1.000000e+00 : f32
    %cst_14 = arith.constant 0.000000e+00 : f32
    %43 = vector.broadcast %cst_13 : f32 to vector<2x8x32xf32>
    %44 = vector.broadcast %cst_14 : f32 to vector<2x8x32xf32>
    %45 = arith.select %42, %43, %44 : vector<2x8x32xi1>, vector<2x8x32xf32>
    %46 = arith.addf %32, %45 : vector<2x8x32xf32>
    %47 = vector.extract_strided_slice %7 {offsets = [0, 2, 0], sizes = [2, 1, 32], strides = [1, 1, 1]} : vector<2x8x32xf32> to vector<2x1x32xf32>
    %48 = vector.broadcast %47 : vector<2x1x32xf32> to vector<2x8x32xf32>
    %49 = arith.cmpf ogt, %48, %7 : vector<2x8x32xf32>
    %50 = vector.broadcast %47 : vector<2x1x32xf32> to vector<2x8x32xf32>
    %51 = arith.cmpf oeq, %50, %7 : vector<2x8x32xf32>
    %cst_15 = arith.constant 2.000000e+00 : f32
    %52 = vector.broadcast %cst_15 : f32 to vector<1x8x1xf32>
    %53 = arith.cmpf ogt, %17, %52 : vector<1x8x1xf32>
    %54 = vector.broadcast %53 : vector<1x8x1xi1> to vector<2x8x32xi1>
    %55 = arith.andi %51, %54 : vector<2x8x32xi1>
    %56 = arith.ori %49, %55 : vector<2x8x32xi1>
    %cst_16 = arith.constant 1.000000e+00 : f32
    %cst_17 = arith.constant 0.000000e+00 : f32
    %57 = vector.broadcast %cst_16 : f32 to vector<2x8x32xf32>
    %58 = vector.broadcast %cst_17 : f32 to vector<2x8x32xf32>
    %59 = arith.select %56, %57, %58 : vector<2x8x32xi1>, vector<2x8x32xf32>
    %60 = arith.addf %46, %59 : vector<2x8x32xf32>
    %61 = vector.extract_strided_slice %7 {offsets = [0, 3, 0], sizes = [2, 1, 32], strides = [1, 1, 1]} : vector<2x8x32xf32> to vector<2x1x32xf32>
    %62 = vector.broadcast %61 : vector<2x1x32xf32> to vector<2x8x32xf32>
    %63 = arith.cmpf ogt, %62, %7 : vector<2x8x32xf32>
    %64 = vector.broadcast %61 : vector<2x1x32xf32> to vector<2x8x32xf32>
    %65 = arith.cmpf oeq, %64, %7 : vector<2x8x32xf32>
    %cst_18 = arith.constant 3.000000e+00 : f32
    %66 = vector.broadcast %cst_18 : f32 to vector<1x8x1xf32>
    %67 = arith.cmpf ogt, %17, %66 : vector<1x8x1xf32>
    %68 = vector.broadcast %67 : vector<1x8x1xi1> to vector<2x8x32xi1>
    %69 = arith.andi %65, %68 : vector<2x8x32xi1>
    %70 = arith.ori %63, %69 : vector<2x8x32xi1>
    %cst_19 = arith.constant 1.000000e+00 : f32
    %cst_20 = arith.constant 0.000000e+00 : f32
    %71 = vector.broadcast %cst_19 : f32 to vector<2x8x32xf32>
    %72 = vector.broadcast %cst_20 : f32 to vector<2x8x32xf32>
    %73 = arith.select %70, %71, %72 : vector<2x8x32xi1>, vector<2x8x32xf32>
    %74 = arith.addf %60, %73 : vector<2x8x32xf32>
    %75 = vector.extract_strided_slice %7 {offsets = [0, 4, 0], sizes = [2, 1, 32], strides = [1, 1, 1]} : vector<2x8x32xf32> to vector<2x1x32xf32>
    %76 = vector.broadcast %75 : vector<2x1x32xf32> to vector<2x8x32xf32>
    %77 = arith.cmpf ogt, %76, %7 : vector<2x8x32xf32>
    %78 = vector.broadcast %75 : vector<2x1x32xf32> to vector<2x8x32xf32>
    %79 = arith.cmpf oeq, %78, %7 : vector<2x8x32xf32>
    %cst_21 = arith.constant 4.000000e+00 : f32
    %80 = vector.broadcast %cst_21 : f32 to vector<1x8x1xf32>
    %81 = arith.cmpf ogt, %17, %80 : vector<1x8x1xf32>
    %82 = vector.broadcast %81 : vector<1x8x1xi1> to vector<2x8x32xi1>
    %83 = arith.andi %79, %82 : vector<2x8x32xi1>
    %84 = arith.ori %77, %83 : vector<2x8x32xi1>
    %cst_22 = arith.constant 1.000000e+00 : f32
    %cst_23 = arith.constant 0.000000e+00 : f32
    %85 = vector.broadcast %cst_22 : f32 to vector<2x8x32xf32>
    %86 = vector.broadcast %cst_23 : f32 to vector<2x8x32xf32>
    %87 = arith.select %84, %85, %86 : vector<2x8x32xi1>, vector<2x8x32xf32>
    %88 = arith.addf %74, %87 : vector<2x8x32xf32>
    %89 = vector.extract_strided_slice %7 {offsets = [0, 5, 0], sizes = [2, 1, 32], strides = [1, 1, 1]} : vector<2x8x32xf32> to vector<2x1x32xf32>
    %90 = vector.broadcast %89 : vector<2x1x32xf32> to vector<2x8x32xf32>
    %91 = arith.cmpf ogt, %90, %7 : vector<2x8x32xf32>
    %92 = vector.broadcast %89 : vector<2x1x32xf32> to vector<2x8x32xf32>
    %93 = arith.cmpf oeq, %92, %7 : vector<2x8x32xf32>
    %cst_24 = arith.constant 5.000000e+00 : f32
    %94 = vector.broadcast %cst_24 : f32 to vector<1x8x1xf32>
    %95 = arith.cmpf ogt, %17, %94 : vector<1x8x1xf32>
    %96 = vector.broadcast %95 : vector<1x8x1xi1> to vector<2x8x32xi1>
    %97 = arith.andi %93, %96 : vector<2x8x32xi1>
    %98 = arith.ori %91, %97 : vector<2x8x32xi1>
    %cst_25 = arith.constant 1.000000e+00 : f32
    %cst_26 = arith.constant 0.000000e+00 : f32
    %99 = vector.broadcast %cst_25 : f32 to vector<2x8x32xf32>
    %100 = vector.broadcast %cst_26 : f32 to vector<2x8x32xf32>
    %101 = arith.select %98, %99, %100 : vector<2x8x32xi1>, vector<2x8x32xf32>
    %102 = arith.addf %88, %101 : vector<2x8x32xf32>
    %103 = vector.extract_strided_slice %7 {offsets = [0, 6, 0], sizes = [2, 1, 32], strides = [1, 1, 1]} : vector<2x8x32xf32> to vector<2x1x32xf32>
    %104 = vector.broadcast %103 : vector<2x1x32xf32> to vector<2x8x32xf32>
    %105 = arith.cmpf ogt, %104, %7 : vector<2x8x32xf32>
    %106 = vector.broadcast %103 : vector<2x1x32xf32> to vector<2x8x32xf32>
    %107 = arith.cmpf oeq, %106, %7 : vector<2x8x32xf32>
    %cst_27 = arith.constant 6.000000e+00 : f32
    %108 = vector.broadcast %cst_27 : f32 to vector<1x8x1xf32>
    %109 = arith.cmpf ogt, %17, %108 : vector<1x8x1xf32>
    %110 = vector.broadcast %109 : vector<1x8x1xi1> to vector<2x8x32xi1>
    %111 = arith.andi %107, %110 : vector<2x8x32xi1>
    %112 = arith.ori %105, %111 : vector<2x8x32xi1>
    %cst_28 = arith.constant 1.000000e+00 : f32
    %cst_29 = arith.constant 0.000000e+00 : f32
    %113 = vector.broadcast %cst_28 : f32 to vector<2x8x32xf32>
    %114 = vector.broadcast %cst_29 : f32 to vector<2x8x32xf32>
    %115 = arith.select %112, %113, %114 : vector<2x8x32xi1>, vector<2x8x32xf32>
    %116 = arith.addf %102, %115 : vector<2x8x32xf32>
    %117 = vector.extract_strided_slice %7 {offsets = [0, 7, 0], sizes = [2, 1, 32], strides = [1, 1, 1]} : vector<2x8x32xf32> to vector<2x1x32xf32>
    %118 = vector.broadcast %117 : vector<2x1x32xf32> to vector<2x8x32xf32>
    %119 = arith.cmpf ogt, %118, %7 : vector<2x8x32xf32>
    %120 = vector.broadcast %117 : vector<2x1x32xf32> to vector<2x8x32xf32>
    %121 = arith.cmpf oeq, %120, %7 : vector<2x8x32xf32>
    %cst_30 = arith.constant 7.000000e+00 : f32
    %122 = vector.broadcast %cst_30 : f32 to vector<1x8x1xf32>
    %123 = arith.cmpf ogt, %17, %122 : vector<1x8x1xf32>
    %124 = vector.broadcast %123 : vector<1x8x1xi1> to vector<2x8x32xi1>
    %125 = arith.andi %121, %124 : vector<2x8x32xi1>
    %126 = arith.ori %119, %125 : vector<2x8x32xi1>
    %cst_31 = arith.constant 1.000000e+00 : f32
    %cst_32 = arith.constant 0.000000e+00 : f32
    %127 = vector.broadcast %cst_31 : f32 to vector<2x8x32xf32>
    %128 = vector.broadcast %cst_32 : f32 to vector<2x8x32xf32>
    %129 = arith.select %126, %127, %128 : vector<2x8x32xi1>, vector<2x8x32xf32>
    %130 = arith.addf %116, %129 : vector<2x8x32xf32>
    %cst_33 = arith.constant 0.000000e+00 : f32
    %131 = vector.broadcast %cst_33 : f32 to vector<2x8x32xf32>
    %132 = vector.extract_strided_slice %130 {offsets = [0, 0, 0], sizes = [2, 1, 32], strides = [1, 1, 1]} : vector<2x8x32xf32> to vector<2x1x32xf32>
    %133 = vector.extract_strided_slice %12 {offsets = [0, 0, 0], sizes = [2, 1, 32], strides = [1, 1, 1]} : vector<2x8x32xf32> to vector<2x1x32xf32>
    %134 = vector.broadcast %17 : vector<1x8x1xf32> to vector<2x8x32xf32>
    %135 = vector.broadcast %132 : vector<2x1x32xf32> to vector<2x8x32xf32>
    %136 = arith.cmpf oeq, %134, %135 : vector<2x8x32xf32>
    %cst_34 = arith.constant 0.000000e+00 : f32
    %137 = vector.shape_cast %133 : vector<2x1x32xf32> to vector<2x1x32xf32>
    %138 = vector.broadcast %137 : vector<2x1x32xf32> to vector<2x8x32xf32>
    %139 = vector.broadcast %cst_34 : f32 to vector<2x8x32xf32>
    %140 = arith.select %136, %138, %139 : vector<2x8x32xi1>, vector<2x8x32xf32>
    %141 = arith.addf %131, %140 : vector<2x8x32xf32>
    %142 = vector.extract_strided_slice %130 {offsets = [0, 1, 0], sizes = [2, 1, 32], strides = [1, 1, 1]} : vector<2x8x32xf32> to vector<2x1x32xf32>
    %143 = vector.extract_strided_slice %12 {offsets = [0, 1, 0], sizes = [2, 1, 32], strides = [1, 1, 1]} : vector<2x8x32xf32> to vector<2x1x32xf32>
    %144 = vector.broadcast %17 : vector<1x8x1xf32> to vector<2x8x32xf32>
    %145 = vector.broadcast %142 : vector<2x1x32xf32> to vector<2x8x32xf32>
    %146 = arith.cmpf oeq, %144, %145 : vector<2x8x32xf32>
    %cst_35 = arith.constant 0.000000e+00 : f32
    %147 = vector.shape_cast %143 : vector<2x1x32xf32> to vector<2x1x32xf32>
    %148 = vector.broadcast %147 : vector<2x1x32xf32> to vector<2x8x32xf32>
    %149 = vector.broadcast %cst_35 : f32 to vector<2x8x32xf32>
    %150 = arith.select %146, %148, %149 : vector<2x8x32xi1>, vector<2x8x32xf32>
    %151 = arith.addf %141, %150 : vector<2x8x32xf32>
    %152 = vector.extract_strided_slice %130 {offsets = [0, 2, 0], sizes = [2, 1, 32], strides = [1, 1, 1]} : vector<2x8x32xf32> to vector<2x1x32xf32>
    %153 = vector.extract_strided_slice %12 {offsets = [0, 2, 0], sizes = [2, 1, 32], strides = [1, 1, 1]} : vector<2x8x32xf32> to vector<2x1x32xf32>
    %154 = vector.broadcast %17 : vector<1x8x1xf32> to vector<2x8x32xf32>
    %155 = vector.broadcast %152 : vector<2x1x32xf32> to vector<2x8x32xf32>
    %156 = arith.cmpf oeq, %154, %155 : vector<2x8x32xf32>
    %cst_36 = arith.constant 0.000000e+00 : f32
    %157 = vector.shape_cast %153 : vector<2x1x32xf32> to vector<2x1x32xf32>
    %158 = vector.broadcast %157 : vector<2x1x32xf32> to vector<2x8x32xf32>
    %159 = vector.broadcast %cst_36 : f32 to vector<2x8x32xf32>
    %160 = arith.select %156, %158, %159 : vector<2x8x32xi1>, vector<2x8x32xf32>
    %161 = arith.addf %151, %160 : vector<2x8x32xf32>
    %162 = vector.extract_strided_slice %130 {offsets = [0, 3, 0], sizes = [2, 1, 32], strides = [1, 1, 1]} : vector<2x8x32xf32> to vector<2x1x32xf32>
    %163 = vector.extract_strided_slice %12 {offsets = [0, 3, 0], sizes = [2, 1, 32], strides = [1, 1, 1]} : vector<2x8x32xf32> to vector<2x1x32xf32>
    %164 = vector.broadcast %17 : vector<1x8x1xf32> to vector<2x8x32xf32>
    %165 = vector.broadcast %162 : vector<2x1x32xf32> to vector<2x8x32xf32>
    %166 = arith.cmpf oeq, %164, %165 : vector<2x8x32xf32>
    %cst_37 = arith.constant 0.000000e+00 : f32
    %167 = vector.shape_cast %163 : vector<2x1x32xf32> to vector<2x1x32xf32>
    %168 = vector.broadcast %167 : vector<2x1x32xf32> to vector<2x8x32xf32>
    %169 = vector.broadcast %cst_37 : f32 to vector<2x8x32xf32>
    %170 = arith.select %166, %168, %169 : vector<2x8x32xi1>, vector<2x8x32xf32>
    %171 = arith.addf %161, %170 : vector<2x8x32xf32>
    %172 = vector.extract_strided_slice %130 {offsets = [0, 4, 0], sizes = [2, 1, 32], strides = [1, 1, 1]} : vector<2x8x32xf32> to vector<2x1x32xf32>
    %173 = vector.extract_strided_slice %12 {offsets = [0, 4, 0], sizes = [2, 1, 32], strides = [1, 1, 1]} : vector<2x8x32xf32> to vector<2x1x32xf32>
    %174 = vector.broadcast %17 : vector<1x8x1xf32> to vector<2x8x32xf32>
    %175 = vector.broadcast %172 : vector<2x1x32xf32> to vector<2x8x32xf32>
    %176 = arith.cmpf oeq, %174, %175 : vector<2x8x32xf32>
    %cst_38 = arith.constant 0.000000e+00 : f32
    %177 = vector.shape_cast %173 : vector<2x1x32xf32> to vector<2x1x32xf32>
    %178 = vector.broadcast %177 : vector<2x1x32xf32> to vector<2x8x32xf32>
    %179 = vector.broadcast %cst_38 : f32 to vector<2x8x32xf32>
    %180 = arith.select %176, %178, %179 : vector<2x8x32xi1>, vector<2x8x32xf32>
    %181 = arith.addf %171, %180 : vector<2x8x32xf32>
    %182 = vector.extract_strided_slice %130 {offsets = [0, 5, 0], sizes = [2, 1, 32], strides = [1, 1, 1]} : vector<2x8x32xf32> to vector<2x1x32xf32>
    %183 = vector.extract_strided_slice %12 {offsets = [0, 5, 0], sizes = [2, 1, 32], strides = [1, 1, 1]} : vector<2x8x32xf32> to vector<2x1x32xf32>
    %184 = vector.broadcast %17 : vector<1x8x1xf32> to vector<2x8x32xf32>
    %185 = vector.broadcast %182 : vector<2x1x32xf32> to vector<2x8x32xf32>
    %186 = arith.cmpf oeq, %184, %185 : vector<2x8x32xf32>
    %cst_39 = arith.constant 0.000000e+00 : f32
    %187 = vector.shape_cast %183 : vector<2x1x32xf32> to vector<2x1x32xf32>
    %188 = vector.broadcast %187 : vector<2x1x32xf32> to vector<2x8x32xf32>
    %189 = vector.broadcast %cst_39 : f32 to vector<2x8x32xf32>
    %190 = arith.select %186, %188, %189 : vector<2x8x32xi1>, vector<2x8x32xf32>
    %191 = arith.addf %181, %190 : vector<2x8x32xf32>
    %192 = vector.extract_strided_slice %130 {offsets = [0, 6, 0], sizes = [2, 1, 32], strides = [1, 1, 1]} : vector<2x8x32xf32> to vector<2x1x32xf32>
    %193 = vector.extract_strided_slice %12 {offsets = [0, 6, 0], sizes = [2, 1, 32], strides = [1, 1, 1]} : vector<2x8x32xf32> to vector<2x1x32xf32>
    %194 = vector.broadcast %17 : vector<1x8x1xf32> to vector<2x8x32xf32>
    %195 = vector.broadcast %192 : vector<2x1x32xf32> to vector<2x8x32xf32>
    %196 = arith.cmpf oeq, %194, %195 : vector<2x8x32xf32>
    %cst_40 = arith.constant 0.000000e+00 : f32
    %197 = vector.shape_cast %193 : vector<2x1x32xf32> to vector<2x1x32xf32>
    %198 = vector.broadcast %197 : vector<2x1x32xf32> to vector<2x8x32xf32>
    %199 = vector.broadcast %cst_40 : f32 to vector<2x8x32xf32>
    %200 = arith.select %196, %198, %199 : vector<2x8x32xi1>, vector<2x8x32xf32>
    %201 = arith.addf %191, %200 : vector<2x8x32xf32>
    %202 = vector.extract_strided_slice %130 {offsets = [0, 7, 0], sizes = [2, 1, 32], strides = [1, 1, 1]} : vector<2x8x32xf32> to vector<2x1x32xf32>
    %203 = vector.extract_strided_slice %12 {offsets = [0, 7, 0], sizes = [2, 1, 32], strides = [1, 1, 1]} : vector<2x8x32xf32> to vector<2x1x32xf32>
    %204 = vector.broadcast %17 : vector<1x8x1xf32> to vector<2x8x32xf32>
    %205 = vector.broadcast %202 : vector<2x1x32xf32> to vector<2x8x32xf32>
    %206 = arith.cmpf oeq, %204, %205 : vector<2x8x32xf32>
    %cst_41 = arith.constant 0.000000e+00 : f32
    %207 = vector.shape_cast %203 : vector<2x1x32xf32> to vector<2x1x32xf32>
    %208 = vector.broadcast %207 : vector<2x1x32xf32> to vector<2x8x32xf32>
    %209 = vector.broadcast %cst_41 : f32 to vector<2x8x32xf32>
    %210 = arith.select %206, %208, %209 : vector<2x8x32xi1>, vector<2x8x32xf32>
    %211 = arith.addf %201, %210 : vector<2x8x32xf32>
    %212 = vector.broadcast %15 : vector<2x1x32xf32> to vector<2x8x32xf32>
    %213 = arith.mulf %211, %212 : vector<2x8x32xf32>
    %214 = arith.mulf %7, %213 : vector<2x8x32xf32>
    %cst_42 = arith.constant dense<0.000000e+00> : vector<2x32xf32>
    %215 = vector.multi_reduction <add>, %214, %cst_42 [1] : vector<2x8x32xf32> to vector<2x32xf32>
    %cst_43 = arith.constant 0.000000e+00 : f32
    %216 = vector.shape_cast %3 : vector<2x8x1xi1> to vector<2x8x1xi1>
    %217 = vector.broadcast %216 : vector<2x8x1xi1> to vector<2x8x32xi1>
    %218 = vector.broadcast %cst_43 : f32 to vector<2x8x32xf32>
    %219 = arith.select %217, %218, %0 : vector<2x8x32xi1>, vector<2x8x32xf32>
    %220 = vector.shape_cast %219 : vector<2x8x32xf32> to vector<16x32xf32>
    %c0_44 = arith.constant 0 : index
    %c0_45 = arith.constant 0 : index
    %221 = vector.load %arg3[%c0_44, %c0_45] : memref<32x32xf32, #tpu.memory_space<vmem>>, vector<32x32xf32>
    %cst_46 = arith.constant dense<0.000000e+00> : vector<16x32xf32>
    %222 = tpu.matmul %220, %221, %cst_46 {dimension_numbers = #tpu.dot_dimension_numbers<[1], [0], [0], [1], [0, 0, 1, 1], [], []>} : vector<16x32xf32>, vector<32x32xf32>, vector<16x32xf32> -> vector<16x32xf32>
    %c0_47 = arith.constant 0 : index
    %c0_48 = arith.constant 0 : index
    %223 = vector.load %arg4[%c0_47, %c0_48] : memref<1x32xf32, #tpu.memory_space<vmem>>, vector<1x32xf32>
    %224 = vector.broadcast %223 : vector<1x32xf32> to vector<16x32xf32>
    %225 = arith.addf %222, %224 : vector<16x32xf32>
    %cst_49 = arith.constant 0.000000e+00 : f32
    %226 = vector.broadcast %cst_49 : f32 to vector<16x32xf32>
    %227 = arith.maximumf %225, %226 : vector<16x32xf32>
    %228 = vector.shape_cast %227 : vector<16x32xf32> to vector<2x8x32xf32>
    %cst_50 = arith.constant dense<0xFF800000> : vector<2x32xf32>
    %229 = vector.multi_reduction <maximumf>, %228, %cst_50 [1] : vector<2x8x32xf32> to vector<2x32xf32>
    %230 = vector.shape_cast %229 : vector<2x32xf32> to vector<2x1x32xf32>
    %231 = vector.broadcast %230 : vector<2x1x32xf32> to vector<2x8x32xf32>
    %232 = arith.subf %228, %231 : vector<2x8x32xf32>
    %233 = math.exp %232 : vector<2x8x32xf32>
    %cst_51 = arith.constant dense<0.000000e+00> : vector<2x32xf32>
    %234 = vector.multi_reduction <add>, %233, %cst_51 [1] : vector<2x8x32xf32> to vector<2x32xf32>
    %235 = vector.shape_cast %234 : vector<2x32xf32> to vector<2x1x32xf32>
    %236 = tpu.reciprocal %235 {approx = true} : vector<2x1x32xf32> -> vector<2x1x32xf32>
    %237 = vector.broadcast %236 : vector<2x1x32xf32> to vector<2x8x32xf32>
    %238 = arith.mulf %233, %237 : vector<2x8x32xf32>
    %239 = arith.mulf %219, %238 : vector<2x8x32xf32>
    %cst_52 = arith.constant dense<0.000000e+00> : vector<2x32xf32>
    %240 = vector.multi_reduction <add>, %239, %cst_52 [1] : vector<2x8x32xf32> to vector<2x32xf32>
    %c0_53 = arith.constant 0 : index
    %c0_54 = arith.constant 0 : index
    %241 = vector.load %arg5[%c0_53, %c0_54] : memref<1x32xf32, #tpu.memory_space<vmem>>, vector<1x32xf32>
    %c0_55 = arith.constant 0 : index
    %c0_56 = arith.constant 0 : index
    %242 = vector.load %arg6[%c0_55, %c0_56] : memref<1x1xf32, #tpu.memory_space<vmem>>, vector<1x1xf32>
    %243 = vector.broadcast %241 : vector<1x32xf32> to vector<2x32xf32>
    %244 = arith.mulf %240, %243 : vector<2x32xf32>
    %cst_57 = arith.constant dense<0.000000e+00> : vector<2xf32>
    %245 = vector.multi_reduction <add>, %244, %cst_57 [1] : vector<2x32xf32> to vector<2xf32>
    %246 = vector.shape_cast %245 : vector<2xf32> to vector<2x1xf32>
    %247 = vector.broadcast %242 : vector<1x1xf32> to vector<2x1xf32>
    %248 = arith.addf %246, %247 : vector<2x1xf32>
    %249 = vector.broadcast %241 : vector<1x32xf32> to vector<2x32xf32>
    %250 = arith.mulf %215, %249 : vector<2x32xf32>
    %cst_58 = arith.constant dense<0.000000e+00> : vector<2xf32>
    %251 = vector.multi_reduction <add>, %250, %cst_58 [1] : vector<2x32xf32> to vector<2xf32>
    %252 = vector.shape_cast %251 : vector<2xf32> to vector<2x1xf32>
    %253 = vector.broadcast %242 : vector<1x1xf32> to vector<2x1xf32>
    %254 = arith.addf %252, %253 : vector<2x1xf32>
    %255 = arith.maximumf %248, %254 : vector<2x1xf32>
    %256 = arith.subf %248, %255 : vector<2x1xf32>
    %257 = math.exp %256 : vector<2x1xf32>
    %258 = arith.subf %254, %255 : vector<2x1xf32>
    %259 = math.exp %258 : vector<2x1xf32>
    %260 = arith.addf %257, %259 : vector<2x1xf32>
    %261 = tpu.reciprocal %260 {approx = true} : vector<2x1xf32> -> vector<2x1xf32>
    %262 = arith.mulf %257, %261 : vector<2x1xf32>
    %263 = vector.broadcast %262 : vector<2x1xf32> to vector<2x32xf32>
    %264 = arith.mulf %240, %263 : vector<2x32xf32>
    %265 = arith.mulf %259, %261 : vector<2x1xf32>
    %266 = vector.broadcast %265 : vector<2x1xf32> to vector<2x32xf32>
    %267 = arith.mulf %215, %266 : vector<2x32xf32>
    %268 = arith.addf %264, %267 : vector<2x32xf32>
    %c0_59 = arith.constant 0 : index
    %c0_60 = arith.constant 0 : index
    %269 = vector.load %arg7[%c0_59, %c0_60] : memref<2x32xf32, #tpu.memory_space<vmem>>, vector<2x32xf32>
    tpu.vector_store %arg7[%c0_59, %c0_60], %268 {strides = array<i32>} : memref<2x32xf32, #tpu.memory_space<vmem>>, vector<2x32xf32>,
    return
  }
  func.func @transform_0(%arg0: i32) -> (i32, i32, i32) {
    %c0_i32 = arith.constant 0 : i32
    %c0_i32_0 = arith.constant 0 : i32
    %c0_i32_1 = arith.constant 0 : i32
    return %arg0, %c0_i32, %c0_i32_0 : i32, i32, i32
  }
  func.func @transform_1(%arg0: i32) -> (i32, i32, i32) {
    %c0_i32 = arith.constant 0 : i32
    %c0_i32_0 = arith.constant 0 : i32
    %c0_i32_1 = arith.constant 0 : i32
    return %arg0, %c0_i32, %c0_i32_0 : i32, i32, i32
  }
  func.func @transform_2(%arg0: i32) -> (i32, i32) {
    %c0_i32 = arith.constant 0 : i32
    %c0_i32_0 = arith.constant 0 : i32
    %c0_i32_1 = arith.constant 0 : i32
    return %c0_i32, %c0_i32_0 : i32, i32
  }
  func.func @transform_3(%arg0: i32) -> (i32, i32) {
    %c0_i32 = arith.constant 0 : i32
    %c0_i32_0 = arith.constant 0 : i32
    %c0_i32_1 = arith.constant 0 : i32
    return %c0_i32, %c0_i32_0 : i32, i32
  }
  func.func @transform_4(%arg0: i32) -> (i32, i32) {
    %c0_i32 = arith.constant 0 : i32
    %c0_i32_0 = arith.constant 0 : i32
    %c0_i32_1 = arith.constant 0 : i32
    return %c0_i32, %c0_i32_0 : i32, i32
  }
  func.func @transform_5(%arg0: i32) -> (i32, i32) {
    %c0_i32 = arith.constant 0 : i32
    %c0_i32_0 = arith.constant 0 : i32
    %c0_i32_1 = arith.constant 0 : i32
    return %c0_i32, %c0_i32_0 : i32, i32
  }
  func.func @transform_6(%arg0: i32) -> (i32, i32) {
    %c0_i32 = arith.constant 0 : i32
    %c0_i32_0 = arith.constant 0 : i32
    return %arg0, %c0_i32 : i32, i32
  }
}

</mosaic_0001>

<bundles_post_ra>
// kernel: tpu_custom_call.1
= control target key start
LH: loop header
LB: loop body
LE: loop exit
PB: predicated region body
PF: predicated region fallthrough
CT: control target
= control target key end

     0   :  { %s1187_s0 = inlined_call_operand.vmem [shape: f32[2,8,32], index: 0, kind: input, shape index: {}]   ;;  %s1188_s1 = inlined_call_operand.vmem [shape: f32[2,8,1], index: 1, kind: input, shape index: {}]   ;;  %s1189_s2 = inlined_call_operand.hbm [shape: f32[32,32], index: 2, kind: input, shape index: {}]   ;;  %s1190_s3 = inlined_call_operand.vmem [shape: f32[1,32], index: 3, kind: input, shape index: {}]   ;;  %s1191_s4 = inlined_call_operand.vmem [shape: f32[1,32], index: 4, kind: input, shape index: {}]   ;;  %s1192_s5 = inlined_call_operand.<no memory space> [shape: f32[1,1], index: 5, kind: input, shape index: {}]   ;;  %s1193_s6 = inlined_call_operand.hbm [shape: f32[2,32], index: 6, kind: output, shape index: {}]  }
   0x1   :  { %v11_v0 = vstv %s1192_s5 }
   0x2   :  { %12 = vst [vmem:[#allocation2] sm:$0x1] %v11_v0 }
   0x3   :  { %13 = vsyncpa [#allocation4], 0 }
   0x4   :  { %14 = vsyncpa [#allocation5], 0  ;;  %s812_s23 = smov [#allocation3]  }
   0x5   :  { %s24_s24 = sshll.u32 %s812_s23, 4  ;;  %s25_s24 = int_to_ptr.vmem [resolvable:$true] %s24_s24 }
   0x6   :  { %s776_s25 = scalar_lea.vmem %s25_s24, 512  ;;  %p781_p1 = scmp.lt.s32.totalorder %s25_s24, %s25_s24 }
   0x7   :  { %p777_p0 = scmp.ne.s32.totalorder %s25_s24, %s776_s25  ;;  %p782_p2 = scmp.lt.s32.totalorder %s776_s25, %s776_s25 }
   0x9   :  { %p783_p3 = por %p782_p2, %p781_p1 }
   0xb   :  { %p784_p4 = pnand %p783_p3, %p777_p0 }
   0xd   :  { %787 = shalt.err (!%p784_p4)
}
   0xe   :  { %s813_s26 = smov 128   ;;  %s814_s27 = smov 8  }
   0xf   :  { %30 = dma.hbm_to_vmem [thread:$0]  %s1189_s2, 512, %s25_s24, [#allocation4], %s813_s26, %s813_s26, %s814_s27  }
  0x10   :  { %808 = dma.done.wait [#allocation4], 512  }
  0x11   :  { %809 = vsyncadd [#allocation4], 4294966784  ;;  %v815_v1 = vmov 0   ;;  %v42_v2 = vld [vmem:[%s1188_s1] sm:$0xff]  ;;  %v43_v3 = vld [vmem:[%s1188_s1 + $0x8] sm:$0xff]  ;;  %vm1194_vm2 = vcmask 261120   ;;  %v95_v21 = vlaneseq }
  0x12   :  { %744 = vset.pattern.permute.xlu0 %v815_v1  ;;  %745 = vset.pattern.permute.xlu1 %v815_v1  ;;  %v481_v4 = vld [vmem:[#allocation3 + $0x18] sm:$0xff]  ;;  %vm44_vm0 = vcmp.eq.f32.partialorder %v42_v2, 0.0  ;;  %vm45_vm1 = vcmp.eq.f32.partialorder %v43_v3, 0.0  ;;  %v480_v5 = vld [vmem:[#allocation3 + $0x10] sm:$0xff]  ;;  %v479_v7 = vld [vmem:[#allocation3 + $0x8] sm:$0xff]  ;;  %v816_v50 = vmov 0.0  }
  0x13   :  { %727 = vmatprep.subr.mxu0 %v481_v4  ;;  %v46_v6 = vsel %vm44_vm0, 1, %v815_v1  ;;  %v47_v8 = vsel %vm45_vm1, 1, %v815_v1  ;;  %v478_v9 = vld [vmem:[#allocation3] sm:$0xff]  ;;  %v887_v24 = vshrl.u32 %v95_v21, 7 }
  0x14   :  { %728 = vmatpush3.msra.mxu0 %v481_v4  ;;  %49 = vperm.xlu0 %744, %v46_v6   ;;  %v40_v10 = vld [vmem:[%s1187_s0] sm:$0xff]  ;;  %v41_v14 = vld [vmem:[%s1187_s0 + $0x8] sm:$0xff] }
  0x15   :  { %729 = vmatprep.subr.mxu0 %v480_v5  ;;  %v890_v27 = vsub.s32 0, %v887_v24  ;;  %v893_v28 = vsub.s32 1, %v887_v24  ;;  %v900_v33 = vcvt.s32.f32 %v887_v24  ;;  %v909_v38 = vsub.s32 2, %v887_v24 }
  0x16   :  { %730 = vmatpush3.msra.mxu0 %v480_v5  ;;  %v924_v43 = vsub.s32 3, %v887_v24  ;;  %v943_v49 = vsub.s32 4, %v887_v24  ;;  %v962_v58 = vsub.s32 5, %v887_v24  ;;  %v982_v63 = vsub.s32 6, %v887_v24 }
  0x17   :  { %731 = vmatprep.subr.mxu0 %v479_v7  ;;  %vm110_vm8 = vcmp.gt.f32.partialorder %v900_v33, 0.0  ;;  %vm133_vm11 = vcmp.gt.f32.partialorder %v900_v33, 1.0 }
  0x18   :  { %732 = vmatpush3.msra.mxu0 %v479_v7  ;;  %52 = vperm.xlu0 %744, %v47_v8   ;;  %v1007_v7 = vsub.s32 7, %v887_v24 }
  0x19   :  { %733 = vmatprep.subr.mxu0 %v478_v9 }
  0x1a   :  { %734 = vmatpush3.msra.mxu0 %v478_v9 }
  0x8f   :  { %v50_v11 = vpop.permute.xlu0 %49 }
  0x90   :  { %vm54_vm3 = vcmp.eq.s32.totalorder %v50_v11, 1 }
  0x91   :  { %v868_v12 = vsel %vm54_vm3, -1000.0, %v40_v10  ;;  %v870_v13 = vsel %vm54_vm3, 0.0, %v40_v10 }
  0x92   :  { %735 = vmatprep.mubr.msk.f32.mxu0 %vm1194_vm2, %v870_v13  ;;  %v59_v20 = vsel %vm1194_vm2, %v868_v12, -inf  ;;  %v101_v34 = vrot.slane %v868_v12, %v890_v27  ;;  %v124_v37 = vrot.slane %v868_v12, %v893_v28  ;;  %v147_v42 = vrot.slane %v868_v12, %v909_v38 }
  0x93   :  { %v53_v15 = vpop.permute.xlu0 %52  ;;  %v60_v22 = vrot.slane %v59_v20, 4  ;;  %v170_v48 = vrot.slane %v868_v12, %v924_v43  ;;  %v193_v57 = vrot.slane %v868_v12, %v943_v49  ;;  %v216_v4 = vrot.slane %v868_v12, %v962_v58 }
  0x94   :  { %vm55_vm4 = vcmp.eq.s32.totalorder %v53_v15, 1  ;;  %vm108_vm7 = vcmp.eq.f32.partialorder %v101_v34, %v868_v12  ;;  %vm131_vm15 = vcmp.eq.f32.partialorder %v124_v37, %v868_v12  ;;  %vm106_vm0 = vcmp.gt.f32.partialorder %v101_v34, %v868_v12 }
  0x95   :  { %v877_v16 = vsel %vm55_vm4, -1000.0, %v41_v14  ;;  %v879_v17 = vsel %vm55_vm4, 0.0, %v41_v14  ;;  %v61_v25 = vmax.f32 %v59_v20, %v60_v22  ;;  %vm113_vm14 = vmand %vm108_vm7, %vm110_vm8  ;;  %v239_v14 = vrot.slane %v868_v12, %v982_v63 }
  0x96   :  { %736 = vmatmul.mubr.msk.f32.vlgmr.msra.gmra.mxu0 %vm1194_vm2, %v879_v17  ;;  %v66_v18 = vsel %vm1194_vm2, %v877_v16, -inf  ;;  %v105_v31 = vrot.slane %v877_v16, %v890_v27  ;;  %v128_v32 = vrot.slane %v877_v16, %v893_v28  ;;  %v151_v39 = vrot.slane %v877_v16, %v909_v38  ;;  %vm934_vm7 = vmor %vm106_vm0, %vm113_vm14 }
  0x97   :  { %v67_v19 = vrot.slane %v66_v18, 4  ;;  %v62_v29 = vrot.slane %v61_v25, 2  ;;  %v174_v44 = vrot.slane %v877_v16, %v924_v43  ;;  %v197_v53 = vrot.slane %v877_v16, %v943_v49 }
  0x98   :  { %vm109_vm5 = vcmp.eq.f32.partialorder %v105_v31, %v877_v16  ;;  %vm132_vm6 = vcmp.eq.f32.partialorder %v128_v32, %v877_v16  ;;  %vm107_vm9 = vcmp.gt.f32.partialorder %v105_v31, %v877_v16  ;;  %vm130_vm12 = vcmp.gt.f32.partialorder %v128_v32, %v877_v16  ;;  %v716_v32 = vld [vmem:[%s1190_s3] ss:$0 sm:$0xff] }
  0x99   :  { %v68_v23 = vmax.f32 %v66_v18, %v67_v19  ;;  %v63_v35 = vmax.f32 %v61_v25, %v62_v29  ;;  %vm114_vm10 = vmand %vm109_vm5, %vm110_vm8  ;;  %vm155_vm4 = vcmp.eq.f32.partialorder %v151_v39, %v877_v16  ;;  %vm129_vm5 = vcmp.gt.f32.partialorder %v124_v37, %v868_v12 }
  0x9a   :  { %vm137_vm13 = vmand %vm132_vm6, %vm133_vm11  ;;  %vm154_vm8 = vcmp.eq.f32.partialorder %v147_v42, %v868_v12  ;;  %vm152_vm14 = vcmp.gt.f32.partialorder %v147_v42, %v868_v12  ;;  %vm179_vm0 = vcmp.gt.f32.partialorder %v900_v33, 3.0  ;;  %v117_v59 = vsel %vm934_vm7, 1.0, %v816_v50 }
  0x9b   :  { %v69_v26 = vrot.slane %v68_v23, 2  ;;  %v64_v40 = vrot.slane %v63_v35, 1  ;;  %vm116_vm1 = vmor %vm107_vm9, %vm114_vm10  ;;  %vm156_vm9 = vcmp.gt.f32.partialorder %v900_v33, 2.0  ;;  %vm153_vm10 = vcmp.gt.f32.partialorder %v151_v39, %v877_v16 }
  0x9c   :  { %vm139_vm3 = vmor %vm130_vm12, %vm137_vm13  ;;  %v118_v51 = vsel %vm116_vm1, 1.0, %v816_v50  ;;  %vm178_vm13 = vcmp.eq.f32.partialorder %v174_v44, %v877_v16  ;;  %v220_v62 = vrot.slane %v877_v16, %v962_v58  ;;  %vm175_vm7 = vcmp.gt.f32.partialorder %v170_v48, %v868_v12 }
  0x9d   :  { %v70_v30 = vmax.f32 %v68_v23, %v69_v26  ;;  %v65_v45 = vmax.f32 %v63_v35, %v64_v40  ;;  %vm136_vm6 = vmand %vm131_vm15, %vm133_vm11  ;;  %v141_v52 = vsel %vm139_vm3, 1.0, %v816_v50  ;;  %vm177_vm3 = vcmp.eq.f32.partialorder %v170_v48, %v868_v12 }
  0x9e   :  { %vm160_vm11 = vmand %vm155_vm4, %vm156_vm9  ;;  %v143_v56 = vadd.f32 %v141_v52, %v118_v51  ;;  %vm176_vm4 = vcmp.gt.f32.partialorder %v174_v44, %v877_v16  ;;  %v243_v6 = vrot.slane %v877_v16, %v982_v63  ;;  %v266_v18 = vrot.slane %v877_v16, %v1007_v7 }
  0x9f   :  { %v71_v36 = vrot.slane %v70_v30, 1  ;;  %vm138_vm12 = vmor %vm129_vm5, %vm136_vm6  ;;  %v73_v54 = vsub.f32 %v868_v12, %v65_v45  ;;  %v262_v24 = vrot.slane %v868_v12, %v1007_v7 }
  0xa0   :  { %vm159_vm15 = vmand %vm154_vm8, %vm156_vm9  ;;  %v140_v60 = vsel %vm138_vm12, 1.0, %v816_v50  ;;  %vm201_vm8 = vcmp.eq.f32.partialorder %v197_v53, %v877_v16  ;;  %vm202_vm9 = vcmp.gt.f32.partialorder %v900_v33, 4.0  ;;  %vm200_vm12 = vcmp.eq.f32.partialorder %v193_v57, %v868_v12 }
  0xa1   :  { %v72_v41 = vmax.f32 %v70_v30, %v71_v36  ;;  %vm162_vm1 = vmor %vm153_vm10, %vm160_vm11  ;;  %v75_v0 = vmul.f32 1.442695, %v73_v54  ;;  %v142_v2 = vadd.f32 %v140_v60, %v117_v59 }
  0xa2   :  { %vm183_vm5 = vmand %vm178_vm13, %vm179_vm0  ;;  %v164_v1 = vsel %vm162_vm1, 1.0, %v816_v50  ;;  %vm199_vm13 = vcmp.gt.f32.partialorder %v197_v53, %v877_v16  ;;  %vm225_vm1 = vcmp.gt.f32.partialorder %v900_v33, 5.0 }
  0xa3   :  { %v74_v46 = vsub.f32 %v877_v16, %v72_v41  ;;  %vm973_vm6 = vmor %vm152_vm14, %vm159_vm15  ;;  %v166_v3 = vadd.f32 %v164_v1, %v143_v56 }
  0xa4   :  { %vm182_vm10 = vmand %vm177_vm3, %vm179_vm0  ;;  %vm224_vm0 = vcmp.eq.f32.partialorder %v220_v62, %v877_v16  ;;  %v163_v8 = vsel %vm973_vm6, 1.0, %v816_v50  ;;  %vm198_vm3 = vcmp.gt.f32.partialorder %v193_v57, %v868_v12 }
  0xa5   :  { %v77_v55 = vmul.f32 1.442695, %v74_v46  ;;  %vm185_vm11 = vmor %vm176_vm4, %vm183_vm5  ;;  %v165_v10 = vadd.f32 %v163_v8, %v142_v2 }
  0xa6   :  { %vm206_vm14 = vmand %vm201_vm8, %vm202_vm9  ;;  %v187_v9 = vsel %vm185_vm11, 1.0, %v816_v50  ;;  %vm223_vm8 = vcmp.eq.f32.partialorder %v216_v4, %v868_v12  ;;  %vm221_vm11 = vcmp.gt.f32.partialorder %v216_v4, %v868_v12 }
  0xa7   :  { %746 = vpow2.f32 %v77_v55  ;;  %vm998_vm15 = vmor %vm175_vm7, %vm182_vm10  ;;  %v189_v11 = vadd.f32 %v187_v9, %v166_v3  ;;  %vm222_vm7 = vcmp.gt.f32.partialorder %v220_v62, %v877_v16 }
  0xa8   :  { %748 = vpow2.f32 %v75_v0  ;;  %vm205_vm4 = vmand %vm200_vm12, %vm202_vm9  ;;  %vm247_vm9 = vcmp.eq.f32.partialorder %v243_v6, %v877_v16  ;;  %v186_v19 = vsel %vm998_vm15, 1.0, %v816_v50  ;;  %vm270_vm15 = vcmp.eq.f32.partialorder %v266_v18, %v877_v16 }
  0xa9   :  { %vm208_vm5 = vmor %vm199_vm13, %vm206_vm14  ;;  %v188_v21 = vadd.f32 %v186_v19, %v165_v10  ;;  %vm246_vm14 = vcmp.eq.f32.partialorder %v239_v14, %v868_v12 }
  0xaa   :  { %vm229_vm6 = vmand %vm224_vm0, %vm225_vm1  ;;  %v210_v20 = vsel %vm208_vm5, 1.0, %v816_v50  ;;  %vm248_vm0 = vcmp.gt.f32.partialorder %v900_v33, 6.0  ;;  %vm244_vm5 = vcmp.gt.f32.partialorder %v239_v14, %v868_v12 }
  0xab   :  { %vm1024_vm10 = vmor %vm198_vm3, %vm205_vm4  ;;  %v212_v22 = vadd.f32 %v210_v20, %v189_v11  ;;  %vm245_vm3 = vcmp.gt.f32.partialorder %v243_v6, %v877_v16 }
  0xac   :  { %vm228_vm12 = vmand %vm223_vm8, %vm225_vm1  ;;  %v209_v25 = vsel %vm1024_vm10, 1.0, %v816_v50 }
  0xad   :  { %vm231_vm13 = vmor %vm222_vm7, %vm229_vm6  ;;  %v211_v30 = vadd.f32 %v209_v25, %v188_v21  ;;  %vm271_vm7 = vcmp.gt.f32.partialorder %v900_v33, 7.0  ;;  %vm268_vm6 = vcmp.gt.f32.partialorder %v266_v18, %v877_v16 }
  0xae   :  { %vm252_vm4 = vmand %vm247_vm9, %vm248_vm0  ;;  %v233_v26 = vsel %vm231_vm13, 1.0, %v816_v50  ;;  %vm269_vm9 = vcmp.eq.f32.partialorder %v262_v24, %v868_v12 }
  0xaf   :  { %vm1041_vm2 = vmor %vm221_vm11, %vm228_vm12  ;;  %v235_v31 = vadd.f32 %v233_v26, %v212_v22  ;;  %vm1205_vm11 = vcmask 261120  }
  0xb0   :  { %vm251_vm1 = vmand %vm246_vm14, %vm248_vm0  ;;  %v232_v36 = vsel %vm1041_vm2, 1.0, %v816_v50  ;;  %vm267_vm14 = vcmp.gt.f32.partialorder %v262_v24, %v868_v12 }
  0xb1   :  { %vm254_vm8 = vmor %vm245_vm3, %vm252_vm4  ;;  %v234_v41 = vadd.f32 %v232_v36, %v211_v30 }
  0xb2   :  { %vm275_vm10 = vmand %vm270_vm15, %vm271_vm7  ;;  %v256_v37 = vsel %vm254_vm8, 1.0, %v816_v50 }
  0xb3   :  { %vm253_vm12 = vmor %vm244_vm5, %vm251_vm1  ;;  %v258_v42 = vadd.f32 %v256_v37, %v235_v31 }
  0xb4   :  { %v1052_v29 = vpop.eup %746  ;;  %vm277_vm13 = vmor %vm268_vm6, %vm275_vm10  ;;  %v255_v51 = vsel %vm253_vm12, 1.0, %v816_v50 }
  0xb5   :  { %v86_v35 = vsel %vm1205_vm11, %v1052_v29, 0.0  ;;  %v1069_v39 = vpop.eup %748  ;;  %vm274_vm0 = vmand %vm269_vm9, %vm271_vm7  ;;  %v279_v52 = vsel %vm277_vm13, 1.0, %v816_v50  ;;  %v257_v55 = vadd.f32 %v255_v51, %v234_v41  ;;  %v299_v8 = vrot.slane %v1052_v29, %v890_v27 }
  0xb6   :  { %v87_v47 = vrot.slane %v86_v35, 4  ;;  %vm1206_vm2 = vmmov %vm1205_vm11  ;;  %v1079_v56 = vadd.f32 %v279_v52, %v258_v42  ;;  %v321_v9 = vrot.slane %v1052_v29, %v893_v28  ;;  %v295_v15 = vrot.slane %v1069_v39, %v890_v27 }
  0xb7   :  { %v79_v48 = vsel %vm1206_vm2, %v1069_v39, 0.0  ;;  %vm1207_vm3 = vmmov %vm1206_vm2  ;;  %v317_v25 = vrot.slane %v1069_v39, %v893_v28  ;;  %v343_v31 = vrot.slane %v1052_v29, %v909_v38 }
  0xb8   :  { %vm276_vm4 = vmor %vm267_vm14, %vm274_vm0  ;;  %v88_v60 = vadd.f32 %v87_v47, %v86_v35  ;;  %v80_v0 = vrot.slane %v79_v48, 4  ;;  %v289_v3 = vrot.slane %v1079_v56, %v890_v27  ;;  %v311_v4 = vrot.slane %v1079_v56, %v893_v28 }
  0xb9   :  { %vm1208_vm15 = vmmov %vm1206_vm2  ;;  %v278_v1 = vsel %vm276_vm4, 1.0, %v816_v50  ;;  %v333_v26 = vrot.slane %v1079_v56, %v909_v38  ;;  %v365_v47 = vrot.slane %v1052_v29, %v924_v43 }
  0xba   :  { %v1083_v2 = vadd.f32 %v278_v1, %v257_v55  ;;  %v89_v10 = vrot.slane %v88_v60, 2  ;;  %v81_v50 = vadd.f32 %v80_v0, %v79_v48  ;;  %vm291_vm1 = vcmp.eq.f32.partialorder %v900_v33, %v289_v3  ;;  %vm1209_vm4 = vmmov %vm1206_vm2 }
  0xbb   :  { %vm313_vm5 = vcmp.eq.f32.partialorder %v900_v33, %v311_v4  ;;  %v301_v22 = vsel %vm291_vm1, %v299_v8, 0.0  ;;  %vm335_vm6 = vcmp.eq.f32.partialorder %v900_v33, %v333_v26  ;;  %v361_v1 = vrot.slane %v1069_v39, %v924_v43 }
  0xbc   :  { %v285_v18 = vrot.slane %v1083_v2, %v890_v27  ;;  %v307_v19 = vrot.slane %v1083_v2, %v893_v28  ;;  %v323_v23 = vsel %vm313_vm5, %v321_v9, 0.0  ;;  %v90_v24 = vadd.f32 %v89_v10, %v88_v60 }
  0xbd   :  { %v355_v28 = vrot.slane %v1079_v56, %v924_v43  ;;  %v387_v60 = vrot.slane %v1052_v29, %v943_v49  ;;  %v399_v4 = vrot.slane %v1079_v56, %v962_v58  ;;  %v373_v9 = vrot.slane %v1083_v2, %v943_v49 }
  0xbe   :  { %vm290_vm8 = vcmp.eq.f32.partialorder %v900_v33, %v285_v18  ;;  %vm312_vm7 = vcmp.eq.f32.partialorder %v900_v33, %v307_v19  ;;  %v431_v18 = vrot.slane %v1052_v29, %v982_v63  ;;  %v395_v19 = vrot.slane %v1083_v2, %v962_v58 }
  0xbf   :  { %v300_v37 = vsel %vm290_vm8, %v295_v15, 0.0  ;;  %v322_v41 = vsel %vm312_vm7, %v317_v25, 0.0  ;;  %vm357_vm10 = vcmp.eq.f32.partialorder %v900_v33, %v355_v28  ;;  %vm401_vm13 = vcmp.eq.f32.partialorder %v900_v33, %v399_v4  ;;  %vm1210_vm8 = vmmov %vm1206_vm2 }
  0xc0   :  { %vm378_vm14 = vcmp.eq.f32.partialorder %v900_v33, %v373_v9  ;;  %vm1211_vm7 = vmmov %vm1206_vm2 }
 0x156   :  { %v737_v34 = vpop.f32.mrf.mxu0 }
 0x157   :  { %v567_v40 = vadd.f32 %v737_v34, %v716_v32  ;;  %v325_v34 = vadd.f32 %v323_v23, %v301_v22 }
 0x158   :  { %v561_v44 = vpop.f32.mrf.mxu0 }
 0x159   :  { %v571_v45 = vmax.f32 %v567_v40, 0.0  ;;  %v562_v46 = vadd.f32 %v716_v32, %v561_v44  ;;  %v82_v32 = vrot.slane %v81_v50, 2  ;;  %v91_v40 = vrot.slane %v90_v24, 1 }
 0x15b   :  { %v579_v53 = vsel %vm1207_vm3, %v571_v45, -inf  ;;  %v570_v54 = vmax.f32 %v562_v46, 0.0  ;;  %v345_v46 = vsel %vm335_vm6, %v343_v31, 0.0  ;;  %v83_v48 = vadd.f32 %v82_v32, %v81_v50  ;;  %vm1212_vm6 = vmmov %vm1206_vm2 }
 0x15c   :  { %v580_v57 = vrot.slane %v579_v53, 4  ;;  %v347_v51 = vadd.f32 %v345_v46, %v325_v34  ;;  %v92_v55 = vadd.f32 %v91_v40, %v90_v24  ;;  %v421_v50 = vrot.slane %v1079_v56, %v982_v63 }
 0x15d   :  { %v572_v59 = vsel %vm1208_vm15, %v570_v54, -inf  ;;  %v443_v24 = vrot.slane %v1079_v56, %v1007_v7  ;;  %vm400_vm3 = vcmp.eq.f32.partialorder %v900_v33, %v395_v19 }
 0x15e   :  { %v581_v61 = vmax.f32 %v579_v53, %v580_v57  ;;  %v573_v62 = vrot.slane %v572_v59, 4  ;;  %v339_v53 = vrot.slane %v1069_v39, %v909_v38  ;;  %v324_v57 = vadd.f32 %v322_v41, %v300_v37 }
 0x15f   :  { %vm423_vm0 = vcmp.eq.f32.partialorder %v900_v33, %v421_v50  ;;  %vm445_vm15 = vcmp.eq.f32.partialorder %v900_v33, %v443_v24  ;;  %v439_v41 = vrot.slane %v1083_v2, %v1007_v7 }
 0x160   :  { %v582_v5 = vrot.slane %v581_v61, 2  ;;  %v574_v6 = vmax.f32 %v572_v59, %v573_v62  ;;  %v367_v59 = vsel %vm357_vm10, %v365_v47, 0.0  ;;  %v351_v62 = vrot.slane %v1083_v2, %v924_v43  ;;  %vm1213_vm10 = vmmov %vm1206_vm2 }
 0x161   :  { %v369_v0 = vadd.f32 %v367_v59, %v347_v51  ;;  %v383_v43 = vrot.slane %v1069_v39, %v943_v49  ;;  %v433_v26 = vsel %vm423_vm0, %v431_v18, 0.0  ;;  %vm444_vm5 = vcmp.eq.f32.partialorder %v900_v33, %v439_v41 }
 0x162   :  { %v583_v11 = vmax.f32 %v581_v61, %v582_v5  ;;  %v575_v14 = vrot.slane %v574_v6, 2  ;;  %v84_v61 = vrot.slane %v83_v48, 1  ;;  %vm356_vm12 = vcmp.eq.f32.partialorder %v900_v33, %v351_v62 }
 0x164   :  { %v584_v20 = vrot.slane %v583_v11, 1  ;;  %v576_v21 = vmax.f32 %v574_v6, %v575_v14  ;;  %v409_v6 = vrot.slane %v1052_v29, %v962_v58  ;;  %v85_v8 = vadd.f32 %v84_v61, %v83_v48 }
 0x165   :  { %v449_v48 = vrot.slane %v1069_v39, %v1007_v7 }
 0x166   :  { %v585_v30 = vmax.f32 %v583_v11, %v584_v20  ;;  %v577_v27 = vrot.slane %v576_v21, 1  ;;  %v366_v11 = vsel %vm356_vm12, %v361_v1, 0.0  ;;  %v411_v15 = vsel %vm401_vm13, %v409_v6, 0.0 }
 0x168   :  { %v587_v35 = vsub.f32 %v571_v45, %v585_v30  ;;  %v578_v36 = vmax.f32 %v576_v21, %v577_v27  ;;  %v329_v45 = vrot.slane %v1083_v2, %v909_v38  ;;  %v388_v21 = vsel %vm378_vm14, %v383_v43, 0.0 }
 0x169   :  { %v453_v30 = vrot.slane %v1052_v29, %v1007_v7 }
 0x16a   :  { %v590_v42 = vmul.f32 1.442695, %v587_v35  ;;  %v586_v44 = vsub.f32 %v570_v54, %v578_v36  ;;  %v377_v54 = vrot.slane %v1079_v56, %v943_v49  ;;  %vm334_vm9 = vcmp.eq.f32.partialorder %v900_v33, %v329_v45 }
 0x16b   :  { %v344_v38 = vsel %vm334_vm9, %v339_v53, 0.0  ;;  %v405_v49 = vrot.slane %v1069_v39, %v962_v58  ;;  %v417_v58 = vrot.slane %v1083_v2, %v982_v63  ;;  %v427_v56 = vrot.slane %v1069_v39, %v982_v63 }
 0x16c   :  { %750 = vpow2.f32 %v590_v42  ;;  %v588_v52 = vmul.f32 1.442695, %v586_v44  ;;  %v346_v3 = vadd.f32 %v344_v38, %v324_v57  ;;  %vm379_vm11 = vcmp.eq.f32.partialorder %v900_v33, %v377_v54 }
 0x16d   :  { %v389_v5 = vsel %vm379_vm11, %v387_v60, 0.0  ;;  %v410_v35 = vsel %vm400_vm3, %v405_v49, 0.0  ;;  %v455_v28 = vsel %vm445_vm15, %v453_v30, 0.0  ;;  %vm422_vm1 = vcmp.eq.f32.partialorder %v900_v33, %v417_v58 }
 0x16e   :  { %752 = vpow2.f32 %v588_v52  ;;  %v391_v10 = vadd.f32 %v389_v5, %v369_v0  ;;  %v368_v14 = vadd.f32 %v366_v11, %v346_v3  ;;  %v432_v47 = vsel %vm422_vm1, %v427_v56, 0.0 }
 0x16f   :  { %754 = vrcp.f32 %v92_v55  ;;  %v454_v2 = vsel %vm444_vm5, %v449_v48, 0.0  ;;  %vm639_vm9 = vcmask 1041409   ;;  %vm642_vm11 = vcmask 254976  }
 0x170   :  { %756 = vrcp.f32 %v85_v8  ;;  %v413_v20 = vadd.f32 %v411_v15, %v391_v10  ;;  %v390_v23 = vadd.f32 %v388_v21, %v368_v14 }
 0x172   :  { %v435_v32 = vadd.f32 %v433_v26, %v413_v20  ;;  %v412_v40 = vadd.f32 %v410_v35, %v390_v23 }
 0x174   :  { %v457_v46 = vadd.f32 %v455_v28, %v435_v32  ;;  %v434_v51 = vadd.f32 %v432_v47, %v412_v40 }
 0x176   :  { %v456_v60 = vadd.f32 %v454_v2, %v434_v51 }
 0x179   :  { %v751_v22 = vpop.eup %750 }
 0x17a   :  { %v599_v25 = vsel %vm1206_vm2, %v751_v22, 0.0 }
 0x17b   :  { %v753_v27 = vpop.eup %752  ;;  %v600_v31 = vrot.slane %v599_v25, 4 }
 0x17c   :  { %v592_v34 = vsel %vm1209_vm4, %v753_v27, 0.0  ;;  %v755_v29 = vpop.eup %754 }
 0x17d   :  { %v601_v36 = vadd.f32 %v600_v31, %v599_v25  ;;  %v593_v37 = vrot.slane %v592_v34, 4  ;;  %v459_v52 = vmul.f32 %v755_v29, %v457_v46  ;;  %v757_v57 = vpop.eup %756  ;;  %v720_v46 = vld [vmem:[#allocation2] ss:$0 sm:$0xff] }
 0x17e   :  { %v458_v0 = vmul.f32 %v757_v57, %v456_v60 }
 0x17f   :  { %v602_v42 = vrot.slane %v601_v36, 2  ;;  %v594_v44 = vadd.f32 %v593_v37, %v592_v34  ;;  %v461_v61 = vmul.f32 %v459_v52, %v877_v16 }
 0x180   :  { %v460_v39 = vmul.f32 %v458_v0, %v868_v12 }
 0x181   :  { %v603_v63 = vadd.f32 %v602_v42, %v601_v36  ;;  %v595_v45 = vrot.slane %v594_v44, 2  ;;  %v469_v7 = vsel %vm1210_vm8, %v461_v61, 0.0 }
 0x182   :  { %v470_v38 = vrot.slane %v469_v7, 4  ;;  %v462_v1 = vsel %vm1211_vm7, %v460_v39, 0.0 }
 0x183   :  { %v604_v53 = vrot.slane %v603_v63, 1  ;;  %v596_v55 = vadd.f32 %v595_v45, %v594_v44  ;;  %v463_v33 = vrot.slane %v462_v1, 4 }
 0x184   :  { %v471_v3 = vadd.f32 %v470_v38, %v469_v7 }
 0x185   :  { %v605_v54 = vadd.f32 %v604_v53, %v603_v63  ;;  %v597_v59 = vrot.slane %v596_v55, 1  ;;  %v464_v9 = vadd.f32 %v463_v33, %v462_v1 }
 0x186   :  { %v472_v5 = vrot.slane %v471_v3, 2 }
 0x187   :  { %758 = vrcp.f32 %v605_v54  ;;  %v598_v62 = vadd.f32 %v597_v59, %v596_v55  ;;  %v465_v12 = vrot.slane %v464_v9, 2 }
 0x188   :  { %v473_v11 = vadd.f32 %v472_v5, %v471_v3 }
 0x189   :  { %760 = vrcp.f32 %v598_v62 }
 0x18a   :  { %v474_v20 = vrot.slane %v473_v11, 1 }
 0x18c   :  { %v475_v25 = vadd.f32 %v474_v20, %v473_v11 }
 0x194   :  { %v759_v4 = vpop.eup %758 }
 0x195   :  { %v609_v6 = vmul.f32 %v759_v4, %v751_v22  ;;  %v466_v22 = vadd.f32 %v465_v12, %v464_v9 }
 0x196   :  { %v761_v8 = vpop.eup %760 }
 0x197   :  { %v608_v10 = vmul.f32 %v761_v8, %v753_v27  ;;  %v611_v16 = vmul.f32 %v609_v6, %v879_v17  ;;  %v467_v30 = vrot.slane %v466_v22, 1 }
 0x199   :  { %v610_v43 = vmul.f32 %v608_v10, %v870_v13  ;;  %v619_v14 = vsel %vm1212_vm6, %v611_v16, 0.0  ;;  %v719_v13 = vld [vmem:[%s1191_s4] ss:$0 sm:$0xff]  ;;  %v468_v35 = vadd.f32 %v467_v30, %v466_v22  ;;  %s817_s4 = smov [#allocation6]  }
 0x19a   :  { %v620_v50 = vrot.slane %v619_v14, 4  ;;  %v654_v58 = vmul.f32 %v719_v13, %v475_v25  ;;  %s707_s13 = sshll.u32 %s817_s4, 4  ;;  %s708_s13 = int_to_ptr.vmem [resolvable:$true] %s707_s13 }
 0x19b   :  { %v612_v15 = vsel %vm1213_vm10, %v610_v43, 0.0  ;;  %v653_v29 = vmul.f32 %v719_v13, %v468_v35  ;;  %s788_s14 = scalar_lea.vmem %s708_s13, 32  ;;  %p793_p6 = scmp.lt.s32.totalorder %s708_s13, %s708_s13 }
 0x19c   :  { %v613_v18 = vrot.slane %v612_v15, 4  ;;  %v621_v19 = vadd.f32 %v620_v50, %v619_v14  ;;  %v657_v37 = vrot.slane %v654_v58, 7  ;;  %p789_p5 = scmp.ne.s32.totalorder %s708_s13, %s788_s14  ;;  %p794_p7 = scmp.lt.s32.totalorder %s788_s14, %s788_s14 }
 0x19e   :  { %v614_v21 = vadd.f32 %v613_v18, %v612_v15  ;;  %v622_v49 = vrot.slane %v621_v19, 2  ;;  %v658_v28 = vsel %vm639_vm9, %v657_v37, %v653_v29  ;;  %p795_p8 = por %p794_p7, %p793_p6 }
 0x19f   :  { %v660_v42 = vsel %vm642_vm11, %v658_v28, 0.0 }
 0x1a0   :  { %v615_v23 = vrot.slane %v614_v21, 2  ;;  %v623_v24 = vadd.f32 %v622_v49, %v621_v19  ;;  %p796_p9 = pnand %p795_p8, %p789_p5 }
 0x1a2   :  { %v616_v26 = vadd.f32 %v615_v23, %v614_v21  ;;  %v624_v17 = vrot.slane %v623_v24, 1 }
 0x1a4   :  { %v617_v27 = vrot.slane %v616_v26, 1  ;;  %v625_v31 = vadd.f32 %v624_v17, %v623_v24 }
 0x1a6   :  { %v618_v32 = vadd.f32 %v617_v27, %v616_v26  ;;  %v635_v34 = vmul.f32 %v719_v13, %v625_v31 }
 0x1a8   :  { %v634_v56 = vmul.f32 %v719_v13, %v618_v32  ;;  %v638_v36 = vrot.slane %v635_v34, 7 }
 0x1aa   :  { %v640_v40 = vsel %vm639_vm9, %v638_v36, %v634_v56 }
 0x1ab   :  { %v643_v41 = vsel %vm642_vm11, %v640_v40, 0.0 }
 0x1ac   :  { %644 = vadd.xlane.f32.xlu1 %v643_v41 }
 0x1b0   :  { %661 = vadd.xlane.f32.xlu1 %v660_v42 }
 0x235   :  { %v645_v44 = vpop.xlane.xlu1 %644 }
 0x236   :  { %v652_v48 = vadd.f32 %v720_v46, %v645_v44 }
 0x239   :  { %v662_v47 = vpop.xlane.xlu1 %661 }
 0x23a   :  { %v663_v63 = vadd.f32 %v720_v46, %v662_v47 }
 0x23c   :  { %v664_v45 = vmax.f32 %v652_v48, %v663_v63 }
 0x23e   :  { %v665_v51 = vsub.f32 %v652_v48, %v664_v45  ;;  %v668_v52 = vsub.f32 %v663_v63, %v664_v45 }
 0x240   :  { %v666_v53 = vmul.f32 1.442695, %v665_v51  ;;  %v669_v55 = vmul.f32 1.442695, %v668_v52 }
 0x242   :  { %762 = vpow2.f32 %v666_v53 }
 0x243   :  { %764 = vpow2.f32 %v669_v55 }
 0x24f   :  { %v763_v57 = vpop.eup %762 }
 0x250   :  { %v765_v2 = vpop.eup %764 }
 0x251   :  { %v671_v54 = vadd.f32 %v765_v2, %v763_v57 }
 0x253   :  { %766 = vrcp.f32 %v671_v54 }
 0x260   :  { %v767_v59 = vpop.eup %766 }
 0x261   :  { %v683_v60 = vmul.f32 %v767_v59, %v765_v2  ;;  %v673_v61 = vmul.f32 %v767_v59, %v763_v57 }
 0x263   :  { %686 = vperm.xlu1 %745, %v683_v60   ;;  %676 = vperm.xlu0 %744, %v673_v61  }
 0x2de   :  { %v687_v62 = vpop.permute.xlu1 %686  ;;  %v677_v0 = vpop.permute.xlu0 %676 }
 0x2df   :  { %v688_v7 = vrot.slane %v687_v62, 1  ;;  %v678_v39 = vrot.slane %v677_v0, 1  ;;  %v691_v38 = vmul.f32 %v687_v62, %v468_v35  ;;  %v681_v3 = vmul.f32 %v677_v0, %v618_v32 }
 0x2e1   :  { %v692_v1 = vmul.f32 %v688_v7, %v475_v25  ;;  %v682_v33 = vmul.f32 %v678_v39, %v625_v31  ;;  %v693_v5 = vadd.f32 %v691_v38, %v681_v3 }
 0x2e3   :  { %v694_v4 = vadd.f32 %v692_v1, %v682_v33 }
 0x2e5   :  { %v697_v6 = vrot.slane %v694_v4, 7 }
 0x2e7   :  { %v698_v8 = vsel %vm639_vm9, %v697_v6, %v693_v5 }
 0x2e8   :  { %700 = vst.msk [vmem:[#allocation6] sm:$0x3] %vm642_vm11, %v698_v8 }
 0x2e9   :  { %799 = shalt.err (!%p796_p9)
}
 0x2ea   :  { %710 = dma.vmem_to_hbm [thread:$0]  %s708_s13, 32, %s1193_s6, [#allocation5]  }
 0x2eb   :  { %810 = dma.done.wait [#allocation5], 32  }
 0x2ec   :  { %811 = vsyncadd [#allocation5], 4294967264 }
 0x2ed   :  { %714 = vsyncpa [#allocation4], 1 }
 0x2ee   :  { %715 = vsyncpa [#allocation5], 1 }

</bundles_post_ra>
